<compile_context>
chip_gen: v7x
topology: tpu7x:2x2x1
jax: 0.10.0
libtpu: 0.0.40
codegen_flags: <defaults>
</compile_context>

<pallas_src>
import math
import functools

import jax
import jax.numpy as jnp
from jax.experimental import pallas as pl
from jax.experimental.pallas import tpu as pltpu


def build_pe_table(d_model: int = 32, max_len: int = 1000) -> jnp.ndarray:
    """Replicates the buffer built in PositionalEncoding.__init__ (even d_model)."""
    # NOTE: the torch code's odd-d_model branch (`pe = pe[:, :, d_model-1]`)
    # collapses a dim and is effectively broken; only even d_model is supported,
    # matching the default d_model=32.
    assert d_model % 2 == 0, "only even d_model supported (default d_model=32)"
    position = jnp.arange(max_len, dtype=jnp.float32)[:, None]                  # [L, 1]
    div_term = jnp.exp(jnp.arange(0, d_model, 2, dtype=jnp.float32)
                       * (-math.log(10000.0) / d_model))                        # [D/2]
    pe = jnp.zeros((max_len, d_model), dtype=jnp.float32)
    pe = pe.at[:, 0::2].set(jnp.sin(position * div_term))
    pe = pe.at[:, 1::2].set(jnp.cos(position * div_term))
    return pe                                                                    # [L, D]


# ----------------------------- kernels --------------------------------------


def _pe_add_kernel(x_ref, pe_ref, o_ref):
    # x_ref: [TB, S*D]; pe_ref: [1, S*D] broadcasts over the row axis.
    o_ref[...] = x_ref[...] + pe_ref[...]


def _pe_add_dropout_kernel(x_ref, pe_ref, bits_ref, o_ref, *, threshold, inv_keep):
    y = x_ref[...] + pe_ref[...]
    # Inverted dropout: drop with prob p <=> bits < round(p * 2^32).
    keep = bits_ref[...] >= jnp.uint32(threshold)
    o_ref[...] = jnp.where(keep, y * inv_keep, jnp.zeros_like(y))


# ----------------------------- wrapper --------------------------------------


def _pick_row_tile(num_rows: int, row_bytes: int, target_tile_bytes: int = 1 << 20) -> int:
    """Largest row-tile ~target bytes; sublane-friendly (mult of 8) or full extent."""
    tb = max(1, target_tile_bytes // max(1, row_bytes))
    if tb >= num_rows:
        return num_rows
    return max(8, (tb // 8) * 8)


def positional_encoding(x, pe, *, dropout_p: float = 0.1, training: bool = False,
                        rng_key=None):
    """x: [B, S, D]; pe: [max_len, D] buffer (as built by build_pe_table)."""
    B, S, D = x.shape
    ROW = S * D
    itemsize = jnp.dtype(x.dtype).itemsize

    # Lane-dense layout: [B, S*D] with S*D a multiple of 128 (256 for the
    # default d_model=32, S=8).  PE becomes a single broadcast row, pre-cast
    # to x.dtype so no per-tile cast happens in the kernel.
    xf = x.reshape(B, ROW)
    pe_row = jax.lax.slice(pe, (0, 0), (S, D)).reshape(1, ROW).astype(x.dtype)

    tb = _pick_row_tile(B, ROW * itemsize)
    grid = (pl.cdiv(B, tb),)

    x_spec = pl.BlockSpec((tb, ROW), lambda i: (i, 0))
    pe_spec = pl.BlockSpec((1, ROW), lambda i: (0, 0))
    out_spec = pl.BlockSpec((tb, ROW), lambda i: (i, 0))
    out_shape = jax.ShapeDtypeStruct((B, ROW), x.dtype)

    compiler_params = pltpu.CompilerParams(
        dimension_semantics=("parallel",),     # independent rows -> both TCs on v7x
        vmem_limit_bytes=32 << 20,             # headroom for double-buffered tiles
    )

    use_dropout = bool(training) and float(dropout_p) > 0.0

    if not use_dropout:
        cost = pl.CostEstimate(
            flops=B * ROW,
            transcendentals=0,
            bytes_accessed=2 * B * ROW * itemsize + ROW * itemsize,
        )
        out = pl.pallas_call(
            _pe_add_kernel,
            out_shape=out_shape,
            grid=grid,
            in_specs=[x_spec, pe_spec],
            out_specs=out_spec,
            compiler_params=compiler_params,
            cost_estimate=cost,
        )(xf, pe_row)
    else:
        if rng_key is None:
            rng_key = jax.random.PRNGKey(0)
        bits = jax.random.bits(rng_key, (B, ROW), dtype=jnp.uint32)
        threshold = min(int(round(float(dropout_p) * (1 << 32))), (1 << 32) - 1)
        inv_keep = 1.0 / (1.0 - float(dropout_p))
        kernel = functools.partial(
            _pe_add_dropout_kernel, threshold=threshold, inv_keep=inv_keep
        )
        bits_spec = pl.BlockSpec((tb, ROW), lambda i: (i, 0))
        cost = pl.CostEstimate(
            flops=4 * B * ROW,
            transcendentals=0,
            bytes_accessed=2 * B * ROW * itemsize + ROW * itemsize + B * ROW * 4,
        )
        out = pl.pallas_call(
            kernel,
            out_shape=out_shape,
            grid=grid,
            in_specs=[x_spec, pe_spec, bits_spec],
            out_specs=out_spec,
            compiler_params=compiler_params,
            cost_estimate=cost,
        )(xf, pe_row, bits)

    return out.reshape(B, S, D)


# ------------------------------ demo ----------------------------------------


if __name__ == "__main__":
    d_model, max_len = 32, 1000
    B, S, D = 2, 8, d_model
    dropout_p = 0.1

    key = jax.random.PRNGKey(0)
    kx, kd = jax.random.split(key)
    x = jax.random.normal(kx, (B, S, D), dtype=jnp.float32)
    pe = build_pe_table(d_model=d_model, max_len=max_len)

    # Eval-mode forward (dropout is identity, matching torch .eval()).
    out = jax.block_until_ready(
        positional_encoding(x, pe, dropout_p=dropout_p, training=False)
    )
    ref = x + pe[None, :S, :]
    assert out.shape == (B, S, D)
    assert jnp.allclose(out, ref, atol=1e-6, rtol=1e-6)

    # Training-mode forward: every element is either 0 (dropped) or (x+pe)/(1-p).
    out_tr = jax.block_until_ready(
        positional_encoding(x, pe, dropout_p=dropout_p, training=True, rng_key=kd)
    )
    assert out_tr.shape == (B, S, D)
    scaled = ref / (1.0 - dropout_p)
    ok = jnp.isclose(out_tr, 0.0) | jnp.isclose(out_tr, scaled, atol=1e-5, rtol=1e-5)
    assert bool(jnp.all(ok))

    print("KERNEL_OK")
</pallas_src>

<mosaic_0001>
module attributes {stable_mosaic.version = 11 : i64} {
  func.func @_pe_add_kernel(%arg0: i32, %arg1: memref<2x256xf32, #tpu.memory_space<vmem>>, %arg2: memref<1x256xf32, #tpu.memory_space<vmem>>, %arg3: memref<2x256xf32, #tpu.memory_space<vmem>>) attributes {dimension_semantics = [#tpu.dimension_semantics<parallel>], iteration_bounds = array<i64: 1>, scalar_prefetch = 0 : i64, scratch_operands = 0 : i64, tpu.core_type = #tpu.core_type<tc>, window_params = [{transform_indices = @transform_0, window_bounds = array<i64: 2, 256>}, {pipeline_mode = #tpu.pipeline_mode<synchronous>, transform_indices = @transform_1, window_bounds = array<i64: 1, 256>}, {transform_indices = @transform_2, window_bounds = array<i64: 2, 256>}]} {
    %c0 = arith.constant 0 : index
    %c0_0 = arith.constant 0 : index
    %0 = vector.load %arg1[%c0, %c0_0] : memref<2x256xf32, #tpu.memory_space<vmem>>, vector<2x256xf32>
    %c0_1 = arith.constant 0 : index
    %c0_2 = arith.constant 0 : index
    %1 = vector.load %arg2[%c0_1, %c0_2] : memref<1x256xf32, #tpu.memory_space<vmem>>, vector<1x256xf32>
    %2 = vector.broadcast %1 : vector<1x256xf32> to vector<2x256xf32>
    %3 = arith.addf %0, %2 : vector<2x256xf32>
    %c0_3 = arith.constant 0 : index
    %c0_4 = arith.constant 0 : index
    %4 = vector.load %arg3[%c0_3, %c0_4] : memref<2x256xf32, #tpu.memory_space<vmem>>, vector<2x256xf32>
    tpu.vector_store %arg3[%c0_3, %c0_4], %3 {strides = array<i32>} : memref<2x256xf32, #tpu.memory_space<vmem>>, vector<2x256xf32>,
    return
  }
  func.func @transform_0(%arg0: i32) -> (i32, i32) {
    %c0_i32 = arith.constant 0 : i32
    %c0_i32_0 = arith.constant 0 : i32
    return %arg0, %c0_i32 : i32, i32
  }
  func.func @transform_1(%arg0: i32) -> (i32, i32) {
    %c0_i32 = arith.constant 0 : i32
    %c0_i32_0 = arith.constant 0 : i32
    %c0_i32_1 = arith.constant 0 : i32
    return %c0_i32, %c0_i32_0 : i32, i32
  }
  func.func @transform_2(%arg0: i32) -> (i32, i32) {
    %c0_i32 = arith.constant 0 : i32
    %c0_i32_0 = arith.constant 0 : i32
    return %arg0, %c0_i32 : i32, i32
  }
}

</mosaic_0001>

<bundles_post_ra>
// kernel: tpu_custom_call.1
= control target key start
LH: loop header
LB: loop body
LE: loop exit
PB: predicated region body
PF: predicated region fallthrough
CT: control target
= control target key end

     0   :  { %7 = vsyncpa [#allocation3], 0  ;;  %s157_s0 = inlined_call_operand.hbm [shape: f32[2,256], index: 0, kind: input, shape index: {}]   ;;  %s158_s1 = inlined_call_operand.vmem [shape: f32[1,256], index: 1, kind: input, shape index: {}]   ;;  %s159_s2 = inlined_call_operand.hbm [shape: f32[2,256], index: 2, kind: output, shape index: {}]  }
   0x1   :  { %8 = vsyncpa [#allocation4], 0  ;;  %s112_s9 = smov [#allocation2]   ;;  %s64_s13 = scalar_lea.hbm %s157_s0, 64 }
   0x2   :  { %s15_s10 = sshll.u32 %s112_s9, 4  ;;  %p65_p0 = scmp.ne.s32.totalorder %s157_s0, %s64_s13  ;;  %s16_s10 = int_to_ptr.vmem [resolvable:$true] %s15_s10 }
   0x3   :  { %p68_p1 = scmp.lt.u32.totalorder %s64_s13, %s157_s0 }
   0x5   :  { %p70_p2 = pnand %p68_p1, %p65_p0 }
   0x7   :  { %73 = shalt.err (!%p70_p2)
}
   0x8   :  { %s74_s18 = scalar_lea.vmem %s16_s10, 64  ;;  %p79_p4 = scmp.lt.s32.totalorder %s16_s10, %s16_s10 }
   0x9   :  { %p75_p3 = scmp.ne.s32.totalorder %s16_s10, %s74_s18  ;;  %p80_p5 = scmp.lt.s32.totalorder %s74_s18, %s74_s18 }
   0xb   :  { %p81_p6 = por %p80_p5, %p79_p4 }
   0xd   :  { %p82_p7 = pnand %p81_p6, %p75_p3 }
   0xf   :  { %85 = shalt.err (!%p82_p7)
}
  0x10   :  { %18 = dma.hbm_to_vmem [thread:$0]  %s157_s0, 64, %s16_s10, [#allocation3]  }
  0x11   :  { %108 = dma.done.wait [#allocation3], 64  }
  0x12   :  { %109 = vsyncadd [#allocation3], 4294967232  ;;  %v27_v0 = vlaneseq  ;;  %v113_v1 = vmov 1983009808   ;;  %v25_v7 = vld [vmem:[%s158_s1] sm:$0x3] }
  0x13   :  { %v37_v2 = vunpack.c.l.s4 %v113_v1  ;;  %v24_v12 = vld [vmem:[#allocation2] sm:$0xf]  ;;  %s114_s23 = smov [#allocation5]  }
  0x14   :  { %v28_v3 = vshrl.u32 %v27_v0, 7  ;;  %s52_s0 = sshll.u32 %s114_s23, 4  ;;  %s53_s0 = int_to_ptr.vmem [resolvable:$true] %s52_s0 }
  0x15   :  { %v38_v6 = vunpack.c.0.s8 %v37_v2  ;;  %s86_s24 = scalar_lea.vmem %s53_s0, 64  ;;  %p91_p9 = scmp.lt.s32.totalorder %s53_s0, %s53_s0 }
  0x16   :  { %v29_v4 = vsub.s32 0, %v28_v3  ;;  %v33_v5 = vsub.s32 1, %v28_v3  ;;  %p87_p8 = scmp.ne.s32.totalorder %s53_s0, %s86_s24  ;;  %p92_p10 = scmp.lt.s32.totalorder %s86_s24, %s86_s24 }
  0x17   :  { %v41_v10 = vsub.s32 %v38_v6, %v28_v3 }
  0x18   :  { %v30_v8 = vrot.slane %v25_v7, %v29_v4  ;;  %v34_v9 = vrot.slane %v25_v7, %v33_v5  ;;  %p93_p11 = por %p92_p10, %p91_p9 }
  0x1a   :  { %v35_v11 = vcombine.low %v30_v8, %v34_v9  ;;  %p94_p12 = pnand %p93_p11, %p87_p8 }
  0x1c   :  { %v42_v13 = vrot.slane %v35_v11, %v41_v10 }
  0x1e   :  { %v44_v14 = vadd.f32 %v42_v13, %v24_v12 }
  0x20   :  { %45 = vst [vmem:[#allocation5] sm:$0xf] %v44_v14 }
  0x21   :  { %97 = shalt.err (!%p94_p12)
}
  0x22   :  { %s98_s26 = scalar_lea.hbm %s159_s2, 64 }
  0x23   :  { %p99_p13 = scmp.ne.s32.totalorder %s159_s2, %s98_s26  ;;  %p102_p0 = scmp.lt.u32.totalorder %s98_s26, %s159_s2 }
  0x25   :  { %p104_p1 = pnand %p102_p0, %p99_p13 }
  0x27   :  { %107 = shalt.err (!%p104_p1)
}
  0x28   :  { %55 = dma.vmem_to_hbm [thread:$0]  %s53_s0, 64, %s159_s2, [#allocation4]  }
  0x29   :  { %110 = dma.done.wait [#allocation4], 64  }
  0x2a   :  { %111 = vsyncadd [#allocation4], 4294967232 }
  0x2b   :  { %59 = vsyncpa [#allocation3], 1 }
  0x2c   :  { %60 = vsyncpa [#allocation4], 1 }

</bundles_post_ra>
